<compile_context>
chip_gen: v7x
topology: tpu7x:2x2x1
jax: 0.10.0
libtpu: 0.0.40
codegen_flags: <defaults>
</compile_context>

<pallas_src>
import jax
import jax.numpy as jnp
from jax.experimental import pallas as pl
from jax.experimental.pallas import tpu as pltpu


_MAX_LANES = 1024      # max slab width (multiple of 128, lane-dense)
_MAX_ROW_TILE = 512    # 512 x 1024 f32 = 2 MiB per buffer (v5e-safe footprint)


def _identity_kernel(x_ref, o_ref):
    # Pure pass-through on the VMEM tile (dtype-generic).
    o_ref[...] = x_ref[...]


def _sublane_multiple(dtype):
    """Native sublane packing: 8 rows for 32-bit, 16 for bf16, 32 for int8."""
    itemsize = jnp.dtype(dtype).itemsize
    return max(8, 32 // max(1, itemsize))


def _pick_slab(n, sublane):
    """Pick (cols, padded_rows) minimizing padded elements; prefer wider slabs."""
    best_key, best = None, None
    for cols in range(_MAX_LANES, 0, -128):
        rows = -(-n // cols)
        rows_p = -(-rows // sublane) * sublane
        key = (rows_p * cols, -cols)   # min padding first, then lane-dense
        if best_key is None or key < best_key:
            best_key, best = key, (cols, rows_p)
    return best


def _identity_pallas(x2d):
    """Identity copy of an (R, C) slab; R % sublane == 0, C % 128 == 0."""
    R, C = x2d.shape
    sub = _sublane_multiple(x2d.dtype)
    tr = min(R, _MAX_ROW_TILE)
    tr = max(sub, (tr // sub) * sub)           # keep tile a sublane multiple
    grid = (pl.cdiv(R, tr),)                   # partial last block is masked
    return pl.pallas_call(
        _identity_kernel,
        out_shape=jax.ShapeDtypeStruct((R, C), x2d.dtype),
        grid_spec=pltpu.PrefetchScalarGridSpec(
            num_scalar_prefetch=0,
            grid=grid,
            in_specs=[pl.BlockSpec((tr, C), lambda i: (i, 0))],
            out_specs=pl.BlockSpec((tr, C), lambda i: (i, 0)),
        ),
        # Reuse the input HBM buffer for the output (no second HBM allocation).
        input_output_aliases={0: 0},
        compiler_params=pltpu.CompilerParams(
            dimension_semantics=("parallel",),
        ),
    )(x2d)


@jax.jit
def identity_roundtrip(x):
    """Optimized Pallas identity demo: x -> VMEM -> x (bit-exact, dtype kept)."""
    if x.size == 0:
        return x                                  # nothing to copy
    flat = x.reshape(-1)                          # keep original dtype
    n = flat.shape[0]
    sub = _sublane_multiple(flat.dtype)
    cols, rows_p = _pick_slab(n, sub)
    pad = rows_p * cols - n
    if pad:
        flat = jnp.pad(flat, (0, pad))            # only when actually required
    y2d = _identity_pallas(flat.reshape(rows_p, cols))
    y = y2d.reshape(-1)
    if pad:
        y = y[:n]                                 # slice only when padded
    return y.reshape(x.shape)


def net_forward(data):
    """JAX equivalent of Net.forward.

    The PyTorch forward body is `pass`: no parameters, no computation, returns
    None.  Nothing is launched on this path — exact semantics, zero cost.
    """
    # TODO(synk): Net.forward is empty in the reference module; there is no
    # computation to translate, so no kernel is launched here.
    del data
    return None


if __name__ == "__main__":
    key = jax.random.PRNGKey(0)
    # Small NCHW-style input consistent with a typical conv-net entry point.
    x = jax.random.normal(key, (2, 4, 16, 16), dtype=jnp.float32)

    # Exact forward semantics: empty body -> None, no device work.
    out = net_forward(x)
    assert out is None, "Net.forward must return None (empty forward body)."

    # Demonstration: run the optimized Pallas identity kernel once and block.
    y = jax.block_until_ready(identity_roundtrip(x))
    assert y.shape == x.shape and y.dtype == x.dtype, "identity kernel meta mismatch"
    assert bool(jnp.all(y == x)), "identity kernel value mismatch"

    print("KERNEL_OK")
</pallas_src>

<mosaic_0001>
module attributes {stable_mosaic.version = 11 : i64} {
  func.func @_identity_kernel(%arg0: i32, %arg1: memref<8x256xf32, #tpu.memory_space<vmem>>, %arg2: memref<8x256xf32, #tpu.memory_space<vmem>>) attributes {dimension_semantics = [#tpu.dimension_semantics<parallel>], iteration_bounds = array<i64: 1>, scalar_prefetch = 0 : i64, scratch_operands = 0 : i64, tpu.core_type = #tpu.core_type<tc>, window_params = [{transform_indices = @transform_0, window_bounds = array<i64: 8, 256>}, {transform_indices = @transform_1, window_bounds = array<i64: 8, 256>}]} {
    %c0 = arith.constant 0 : index
    %c0_0 = arith.constant 0 : index
    %0 = vector.load %arg1[%c0, %c0_0] : memref<8x256xf32, #tpu.memory_space<vmem>>, vector<8x256xf32>
    %c0_1 = arith.constant 0 : index
    %c0_2 = arith.constant 0 : index
    %1 = vector.load %arg2[%c0_1, %c0_2] : memref<8x256xf32, #tpu.memory_space<vmem>>, vector<8x256xf32>
    tpu.vector_store %arg2[%c0_1, %c0_2], %0 {strides = array<i32>} : memref<8x256xf32, #tpu.memory_space<vmem>>, vector<8x256xf32>,
    return
  }
  func.func @transform_0(%arg0: i32) -> (i32, i32) {
    %c0_i32 = arith.constant 0 : i32
    %c0_i32_0 = arith.constant 0 : i32
    return %arg0, %c0_i32 : i32, i32
  }
  func.func @transform_1(%arg0: i32) -> (i32, i32) {
    %c0_i32 = arith.constant 0 : i32
    %c0_i32_0 = arith.constant 0 : i32
    return %arg0, %c0_i32 : i32, i32
  }
}

</mosaic_0001>

<bundles_post_ra>
// kernel: identity_roundtrip.1
= control target key start
LH: loop header
LB: loop body
LE: loop exit
PB: predicated region body
PF: predicated region fallthrough
CT: control target
= control target key end

     0   :  { %s38_s0 = inlined_call_operand.vmem [shape: f32[8,256], index: 0, kind: input, shape index: {}, may-alias: {0,1}]   ;;  %s39_s1 = inlined_call_operand.vmem [shape: f32[8,256], index: 1, kind: output, shape index: {}, may-alias: {0,1}]  }
   0x1   :  { %v8_v0 = vld [vmem:[%s38_s0] sm:$0xff]  ;;  %v9_v1 = vld [vmem:[%s38_s0 + $0x8] sm:$0xff] }
   0x2   :  { %10 = vst [vmem:[%s39_s1] sm:$0xff] %v8_v0  ;;  %11 = vst [vmem:[%s39_s1 + $0x8] sm:$0xff] %v9_v1 }

</bundles_post_ra>
